<compile_context>
chip_gen: v7x
topology: tpu7x:2x2x1
jax: 0.10.0
libtpu: 0.0.40
codegen_flags: <defaults>
</compile_context>

<pallas_src>
import functools

import jax
import jax.numpy as jnp
from jax import lax
from jax.experimental import pallas as pl
from jax.experimental.pallas import tpu as pltpu


_TB_MAX = 2048  # max batch tile (lanes); sweep 1024-8192 per generation


def _round_up(x, m):
    return ((x + m - 1) // m) * m


def _choose_batch_tile(B):
    """Large tiles (DMA granularity / per-step overhead), but keep >=4 tiles
    when the batch is big enough so v7x's 2 TensorCores both get >=2 steps."""
    tb = min(_TB_MAX, _round_up(B, 128))
    while tb > 512 and pl.cdiv(B, tb) < 4:
        tb //= 2
    return tb


# ---------------------------------------------------------------------------
# Kernel 1: batched forward (transposed layout, split state/action streams)
# ---------------------------------------------------------------------------
def _bqn_forward_kernel(xs_ref, xa_ref, w1sT_ref, w1aT_ref, b1c_ref,
                        w2T_ref, b2c_ref, w3c_ref, b3_ref, qT_ref):
    # layer 1: W1^T x^T done as two dots (state part + action part), no concat
    z1 = (jnp.dot(w1sT_ref[...], xs_ref[...], preferred_element_type=jnp.float32)
          + jnp.dot(w1aT_ref[...], xa_ref[...], preferred_element_type=jnp.float32)
          + b1c_ref[...])
    h1 = jnp.maximum(z1, 0.0)                                   # (H1, TB)
    h2 = jnp.maximum(
        jnp.dot(w2T_ref[...], h1, preferred_element_type=jnp.float32)
        + b2c_ref[...], 0.0)                                    # (H2, TB)
    # final Linear (out_features=1): VPU multiply + sublane reduce, SMEM bias
    qT_ref[...] = (jnp.sum(h2 * w3c_ref[...], axis=0, keepdims=True)
                   + b3_ref[0, 0])                              # (1, TB)


@jax.jit
def bqn_forward(states, actions, fwd_params):
    """states (B, OBS), actions (B, ACT) -> q (B,), float32."""
    w1sT, w1aT, b1c, w2T, b2c, w3c, b3 = fwd_params
    B, OBS = states.shape
    ACT = actions.shape[1]
    H1 = w1sT.shape[0]
    H2 = w2T.shape[0]

    xsT = states.T                                              # (OBS, B)
    xaT = actions.T                                             # (ACT, B)

    TB = _choose_batch_tile(B)
    n_tiles = pl.cdiv(B, TB)

    qT = pl.pallas_call(
        _bqn_forward_kernel,
        out_shape=jax.ShapeDtypeStruct((1, B), jnp.float32),
        grid=(n_tiles,),
        in_specs=[
            pl.BlockSpec((OBS, TB), lambda i: (0, i)),           # states^T streamed
            pl.BlockSpec((ACT, TB), lambda i: (0, i)),           # actions^T streamed
            pl.BlockSpec((H1, OBS), lambda i: (0, 0)),           # W1s^T resident
            pl.BlockSpec((H1, ACT), lambda i: (0, 0)),           # W1a^T resident
            pl.BlockSpec((H1, 1), lambda i: (0, 0)),             # b1 column
            pl.BlockSpec((H2, H1), lambda i: (0, 0)),            # W2^T resident
            pl.BlockSpec((H2, 1), lambda i: (0, 0)),             # b2 column
            pl.BlockSpec((H2, 1), lambda i: (0, 0)),             # w3 column
            pl.BlockSpec(memory_space=pltpu.MemorySpace.SMEM),   # b3 scalar
        ],
        out_specs=pl.BlockSpec((1, TB), lambda i: (0, i)),       # lane-dense q
        compiler_params=pltpu.CompilerParams(
            dimension_semantics=("parallel",)),                  # 2 TCs on v7x
    )(xsT, xaT, w1sT, w1aT, b1c, w2T, b2c, w3c, b3)

    return qT[0]                                                 # (B,)


# ---------------------------------------------------------------------------
# Kernel 2: fused get_action(greedy=True) — candidate eval + argmax +
# lane-batched gradient ascent + torch selection rule, in one launch.
# ---------------------------------------------------------------------------
def _make_get_action_kernel(lr, steps, low, high):
    def kernel(s_ref, a0_ref, w1s_ref, w1a_ref, b1_ref, w2_ref, b2_ref,
               w3r_ref, b3_ref, a_out_ref, q_out_ref):
        s = s_ref[...]                    # (1, OBS)
        w1s = w1s_ref[...]                # (OBS, H1)
        w1a = w1a_ref[...]                # (ACT, H1)
        b1 = b1_ref[...]                  # (1, H1)
        w2 = w2_ref[...]                  # (H1, H2)
        b2 = b2_ref[...]                  # (1, H2)
        w3r = w3r_ref[...]                # (1, H2)
        b3 = b3_ref[0, 0]

        # Action-independent layer-1 term, hoisted out of the ascent loop.
        sw1 = jnp.dot(s, w1s, preferred_element_type=jnp.float32) + b1  # (1, H1)

        def layers(a):                    # a: (N, ACT) candidates
            z1 = sw1 + jnp.dot(a, w1a, preferred_element_type=jnp.float32)
            h1 = jnp.maximum(z1, 0.0)
            z2 = jnp.dot(h1, w2, preferred_element_type=jnp.float32) + b2
            h2 = jnp.maximum(z2, 0.0)
            return z1, z2, h2

        def qvals(h2):                    # -> (N, 1)
            return jnp.sum(h2 * w3r, axis=1, keepdims=True) + b3

        a0 = a0_ref[...]                  # (N, ACT)
        n_cand = a0.shape[0]
        _, _, h2_0 = layers(a0)
        q0 = qvals(h2_0)                  # (N, 1) q of sampled candidates

        # Single weight copies; backward contractions reuse them with swapped
        # contraction dims (rhs-transposed dots -> MXU, no duplicate weights).
        nt = (((1,), (1,)), ((), ()))

        def step(_, a):
            z1, z2, _ = layers(a)
            g2 = jnp.where(z2 > 0, w3r, 0.0)                              # (N, H2)
            g1 = lax.dot_general(g2, w2, nt,
                                 preferred_element_type=jnp.float32)      # (N, H1)
            g1 = jnp.where(z1 > 0, g1, 0.0)
            ga = lax.dot_general(g1, w1a, nt,
                                 preferred_element_type=jnp.float32)      # (N, ACT)
            # loss = -q  =>  ascend q; clamp after every update (torch clamp_)
            return jnp.clip(a + lr * ga, low, high)

        a = jnp.clip(a0, low, high)
        a = lax.fori_loop(0, steps, step, a, unroll=True)
        _, _, h2_f = layers(a)
        qf = qvals(h2_f)                  # (N, 1) q after ascent

        # torch semantics: j* = argmax(q0) (first max); keep the ascended
        # action only if q(ascended[j*]) > max(q0); else original candidate.
        row = lax.broadcasted_iota(jnp.int32, q0.shape, 0)
        q0max = jnp.max(q0)
        jstar = jnp.min(jnp.where(q0 == q0max, row, n_cand))
        onehot = (row == jstar).astype(jnp.float32)               # (N, 1)

        qf_j = jnp.sum(qf * onehot)
        better = qf_j > q0max
        a_asc = jnp.sum(a * onehot, axis=0, keepdims=True)        # (1, ACT)
        a_org = jnp.sum(a0 * onehot, axis=0, keepdims=True)       # (1, ACT)
        a_out_ref[...] = jnp.where(better, a_asc, a_org)
        q_out_ref[...] = jnp.where(better, qf_j, q0max).reshape(1, 1)

    return kernel


@functools.partial(jax.jit, static_argnames=("lr", "steps", "low", "high"))
def bqn_get_action_greedy(state, cand_actions, grd_params, *, lr, steps, low, high):
    """state (1, OBS), cand_actions (N, ACT) -> (best action (1, ACT), q (1, 1))."""
    w1s, w1a, b1, w2, b2, w3r, b3 = grd_params
    act_dim = cand_actions.shape[1]
    vmem = pl.BlockSpec(memory_space=pltpu.MemorySpace.VMEM)
    smem = pl.BlockSpec(memory_space=pltpu.MemorySpace.SMEM)
    return pl.pallas_call(
        _make_get_action_kernel(lr, steps, low, high),
        out_shape=(jax.ShapeDtypeStruct((1, act_dim), jnp.float32),
                   jax.ShapeDtypeStruct((1, 1), jnp.float32)),
        in_specs=[vmem] * 8 + [smem],
        out_specs=(vmem, vmem),
    )(state, cand_actions, w1s, w1a, b1, w2, b2, w3r, b3)


# ---------------------------------------------------------------------------
# Parameter init / one-time repack + pure-JAX references
# ---------------------------------------------------------------------------
def init_params(key, obs_dim, act_dim, h1, h2):
    """nn.Linear-style U(-1/sqrt(fan_in), 1/sqrt(fan_in)); W stored (in, out)."""
    ks = jax.random.split(key, 6)

    def lin(kw, kb, fan_in, fan_out):
        bound = 1.0 / float(fan_in) ** 0.5
        w = jax.random.uniform(kw, (fan_in, fan_out), jnp.float32, -bound, bound)
        b = jax.random.uniform(kb, (1, fan_out), jnp.float32, -bound, bound)
        return w, b

    w1, b1 = lin(ks[0], ks[1], obs_dim + act_dim, h1)
    w2, b2 = lin(ks[2], ks[3], h1, h2)
    w3, b3 = lin(ks[4], ks[5], h2, 1)
    return (w1, b1, w2, b2, w3, b3)


def prep_params(params, obs_dim):
    """One-time repack (outside the per-call path — no per-call XLA transposes).
    Returns (forward-kernel layout, greedy-kernel layout)."""
    w1, b1, w2, b2, w3, b3 = params
    fwd = (w1[:obs_dim, :].T, w1[obs_dim:, :].T, b1.T, w2.T, b2.T, w3, b3)
    grd = (w1[:obs_dim, :], w1[obs_dim:, :], b1, w2, b2, w3.T, b3)
    return fwd, grd


def bqn_forward_ref(states, actions, params):
    w1, b1, w2, b2, w3, b3 = params
    x = jnp.concatenate([states, actions], axis=1)
    x = jax.nn.relu(x @ w1 + b1)
    x = jax.nn.relu(x @ w2 + b2)
    return x @ w3 + b3


def get_action_greedy_ref(state, cand_actions, params, *, lr, steps, low, high):
    n = cand_actions.shape[0]
    states_rep = jnp.broadcast_to(state, (n, state.shape[1]))
    q_vals = bqn_forward_ref(states_rep, cand_actions, params)[:, 0]
    j = int(jnp.argmax(q_vals))
    q_best0 = q_vals[j]
    a = jnp.clip(cand_actions[j][None, :], low, high)
    q_fn = lambda a_: jnp.sum(bqn_forward_ref(state, a_, params))
    for _ in range(steps):
        g = jax.grad(q_fn)(a)             # loss = -q  =>  a <- a + lr * dq/da
        a = jnp.clip(a + lr * g, low, high)
    q_fin = bqn_forward_ref(state, a, params)[0, 0]
    if bool(q_fin > q_best0):
        return a[0], q_fin
    return cand_actions[j], q_best0


if __name__ == "__main__":
    OBS, ACT, H1, H2 = 8, 4, 32, 32
    B = 256                       # many action samples / envs per call

    key = jax.random.PRNGKey(0)
    k_s, k_a, k_p = jax.random.split(key, 3)
    states = jax.random.normal(k_s, (B, OBS), jnp.float32)
    actions = jax.random.uniform(k_a, (B, ACT), jnp.float32, -1.0, 1.0)
    params = init_params(k_p, OBS, ACT, H1, H2)
    fwd_p, grd_p = prep_params(params, OBS)

    # --- batched forward (q-values over sampled actions) ---
    q = jax.block_until_ready(bqn_forward(states, actions, fwd_p))
    q_ref = bqn_forward_ref(states, actions, params)[:, 0]
    assert q.shape == (B,)
    assert jnp.allclose(q, q_ref, atol=1e-4, rtol=1e-4)

    # odd batch (num_action_samples=10) exercises the partial-tile path
    q10 = jax.block_until_ready(bqn_forward(states[:10], actions[:10], fwd_p))
    assert q10.shape == (10,)
    assert jnp.allclose(q10, q_ref[:10], atol=1e-4, rtol=1e-4)

    # --- fused get_action(greedy=True): eval candidates + argmax + ascent ---
    N = 10
    state0 = states[:1]
    cand = actions[:N]
    a_best, q_best = jax.block_until_ready(
        bqn_get_action_greedy(state0, cand, grd_p,
                              lr=0.1, steps=8, low=-1.0, high=1.0))
    a_ref, q_ref2 = get_action_greedy_ref(state0, cand, params,
                                          lr=0.1, steps=8, low=-1.0, high=1.0)
    assert a_best.shape == (1, ACT) and q_best.shape == (1, 1)
    assert jnp.allclose(a_best[0], a_ref, atol=2e-3, rtol=2e-3)
    assert jnp.allclose(q_best[0, 0], q_ref2, atol=2e-3, rtol=2e-3)

    # TODO(synk): action_space.sample() RNG and the final .cpu().numpy()
    # conversion of get_action remain host-side (outside the kernels).
    print("KERNEL_OK")
</pallas_src>

<mosaic_0001>
module attributes {stable_mosaic.version = 11 : i64} {
  func.func @_bqn_forward_kernel(%arg0: i32, %arg1: memref<8x256xf32, #tpu.memory_space<vmem>>, %arg2: memref<4x256xf32, #tpu.memory_space<vmem>>, %arg3: memref<32x8xf32, #tpu.memory_space<vmem>>, %arg4: memref<32x4xf32, #tpu.memory_space<vmem>>, %arg5: memref<32x1xf32, #tpu.memory_space<vmem>>, %arg6: memref<32x32xf32, #tpu.memory_space<vmem>>, %arg7: memref<32x1xf32, #tpu.memory_space<vmem>>, %arg8: memref<32x1xf32, #tpu.memory_space<vmem>>, %arg9: memref<1x1xf32, #tpu.memory_space<smem>>, %arg10: memref<1x256xf32, #tpu.memory_space<vmem>>) attributes {dimension_semantics = [#tpu.dimension_semantics<parallel>], iteration_bounds = array<i64: 1>, scalar_prefetch = 0 : i64, scratch_operands = 0 : i64, tpu.core_type = #tpu.core_type<tc>, window_params = [{transform_indices = @transform_0, window_bounds = array<i64: 8, 256>}, {transform_indices = @transform_1, window_bounds = array<i64: 4, 256>}, {pipeline_mode = #tpu.pipeline_mode<synchronous>, transform_indices = @transform_2, window_bounds = array<i64: 32, 8>}, {pipeline_mode = #tpu.pipeline_mode<synchronous>, transform_indices = @transform_3, window_bounds = array<i64: 32, 4>}, {pipeline_mode = #tpu.pipeline_mode<synchronous>, transform_indices = @transform_4, window_bounds = array<i64: 32, 1>}, {pipeline_mode = #tpu.pipeline_mode<synchronous>, transform_indices = @transform_5, window_bounds = array<i64: 32, 32>}, {pipeline_mode = #tpu.pipeline_mode<synchronous>, transform_indices = @transform_6, window_bounds = array<i64: 32, 1>}, {pipeline_mode = #tpu.pipeline_mode<synchronous>, transform_indices = @transform_7, window_bounds = array<i64: 32, 1>}, {transform_indices = @transform_8, window_bounds = array<i64: 1, 1>}, {transform_indices = @transform_9, window_bounds = array<i64: 1, 256>}]} {
    %c0 = arith.constant 0 : index
    %c0_0 = arith.constant 0 : index
    %0 = vector.load %arg3[%c0, %c0_0] : memref<32x8xf32, #tpu.memory_space<vmem>>, vector<32x8xf32>
    %c0_1 = arith.constant 0 : index
    %c0_2 = arith.constant 0 : index
    %1 = vector.load %arg1[%c0_1, %c0_2] : memref<8x256xf32, #tpu.memory_space<vmem>>, vector<8x256xf32>
    %cst = arith.constant dense<0.000000e+00> : vector<32x256xf32>
    %2 = tpu.matmul %0, %1, %cst {dimension_numbers = #tpu.dot_dimension_numbers<[1], [0], [0], [1], [0, 0, 1, 1], [], []>} : vector<32x8xf32>, vector<8x256xf32>, vector<32x256xf32> -> vector<32x256xf32>
    %c0_3 = arith.constant 0 : index
    %c0_4 = arith.constant 0 : index
    %3 = vector.load %arg4[%c0_3, %c0_4] : memref<32x4xf32, #tpu.memory_space<vmem>>, vector<32x4xf32>
    %c0_5 = arith.constant 0 : index
    %c0_6 = arith.constant 0 : index
    %4 = vector.load %arg2[%c0_5, %c0_6] : memref<4x256xf32, #tpu.memory_space<vmem>>, vector<4x256xf32>
    %cst_7 = arith.constant dense<0.000000e+00> : vector<32x256xf32>
    %5 = tpu.matmul %3, %4, %cst_7 {dimension_numbers = #tpu.dot_dimension_numbers<[1], [0], [0], [1], [0, 0, 1, 1], [], []>} : vector<32x4xf32>, vector<4x256xf32>, vector<32x256xf32> -> vector<32x256xf32>
    %6 = arith.addf %2, %5 : vector<32x256xf32>
    %c0_8 = arith.constant 0 : index
    %c0_9 = arith.constant 0 : index
    %7 = vector.load %arg5[%c0_8, %c0_9] : memref<32x1xf32, #tpu.memory_space<vmem>>, vector<32x1xf32>
    %8 = vector.broadcast %7 : vector<32x1xf32> to vector<32x256xf32>
    %9 = arith.addf %6, %8 : vector<32x256xf32>
    %cst_10 = arith.constant 0.000000e+00 : f32
    %10 = vector.broadcast %cst_10 : f32 to vector<32x256xf32>
    %11 = arith.maximumf %9, %10 : vector<32x256xf32>
    %c0_11 = arith.constant 0 : index
    %c0_12 = arith.constant 0 : index
    %12 = vector.load %arg6[%c0_11, %c0_12] : memref<32x32xf32, #tpu.memory_space<vmem>>, vector<32x32xf32>
    %cst_13 = arith.constant dense<0.000000e+00> : vector<32x256xf32>
    %13 = tpu.matmul %12, %11, %cst_13 {dimension_numbers = #tpu.dot_dimension_numbers<[1], [0], [0], [1], [0, 0, 1, 1], [], []>} : vector<32x32xf32>, vector<32x256xf32>, vector<32x256xf32> -> vector<32x256xf32>
    %c0_14 = arith.constant 0 : index
    %c0_15 = arith.constant 0 : index
    %14 = vector.load %arg7[%c0_14, %c0_15] : memref<32x1xf32, #tpu.memory_space<vmem>>, vector<32x1xf32>
    %15 = vector.broadcast %14 : vector<32x1xf32> to vector<32x256xf32>
    %16 = arith.addf %13, %15 : vector<32x256xf32>
    %cst_16 = arith.constant 0.000000e+00 : f32
    %17 = vector.broadcast %cst_16 : f32 to vector<32x256xf32>
    %18 = arith.maximumf %16, %17 : vector<32x256xf32>
    %c0_17 = arith.constant 0 : index
    %c0_18 = arith.constant 0 : index
    %19 = vector.load %arg8[%c0_17, %c0_18] : memref<32x1xf32, #tpu.memory_space<vmem>>, vector<32x1xf32>
    %20 = vector.broadcast %19 : vector<32x1xf32> to vector<32x256xf32>
    %21 = arith.mulf %18, %20 : vector<32x256xf32>
    %cst_19 = arith.constant dense<0.000000e+00> : vector<256xf32>
    %22 = vector.multi_reduction <add>, %21, %cst_19 [0] : vector<32x256xf32> to vector<256xf32>
    %23 = vector.shape_cast %22 : vector<256xf32> to vector<1x256xf32>
    %c0_20 = arith.constant 0 : index
    %c0_21 = arith.constant 0 : index
    %24 = memref.load %arg9[%c0_20, %c0_21] : memref<1x1xf32, #tpu.memory_space<smem>>
    %25 = vector.broadcast %24 : f32 to vector<1x256xf32>
    %26 = arith.addf %23, %25 : vector<1x256xf32>
    %c0_22 = arith.constant 0 : index
    %c0_23 = arith.constant 0 : index
    %27 = vector.load %arg10[%c0_22, %c0_23] : memref<1x256xf32, #tpu.memory_space<vmem>>, vector<1x256xf32>
    tpu.vector_store %arg10[%c0_22, %c0_23], %26 {strides = array<i32>} : memref<1x256xf32, #tpu.memory_space<vmem>>, vector<1x256xf32>,
    return
  }
  func.func @transform_0(%arg0: i32) -> (i32, i32) {
    %c0_i32 = arith.constant 0 : i32
    %c0_i32_0 = arith.constant 0 : i32
    return %c0_i32, %arg0 : i32, i32
  }
  func.func @transform_1(%arg0: i32) -> (i32, i32) {
    %c0_i32 = arith.constant 0 : i32
    %c0_i32_0 = arith.constant 0 : i32
    return %c0_i32, %arg0 : i32, i32
  }
  func.func @transform_2(%arg0: i32) -> (i32, i32) {
    %c0_i32 = arith.constant 0 : i32
    %c0_i32_0 = arith.constant 0 : i32
    %c0_i32_1 = arith.constant 0 : i32
    return %c0_i32, %c0_i32_0 : i32, i32
  }
  func.func @transform_3(%arg0: i32) -> (i32, i32) {
    %c0_i32 = arith.constant 0 : i32
    %c0_i32_0 = arith.constant 0 : i32
    %c0_i32_1 = arith.constant 0 : i32
    return %c0_i32, %c0_i32_0 : i32, i32
  }
  func.func @transform_4(%arg0: i32) -> (i32, i32) {
    %c0_i32 = arith.constant 0 : i32
    %c0_i32_0 = arith.constant 0 : i32
    %c0_i32_1 = arith.constant 0 : i32
    return %c0_i32, %c0_i32_0 : i32, i32
  }
  func.func @transform_5(%arg0: i32) -> (i32, i32) {
    %c0_i32 = arith.constant 0 : i32
    %c0_i32_0 = arith.constant 0 : i32
    %c0_i32_1 = arith.constant 0 : i32
    return %c0_i32, %c0_i32_0 : i32, i32
  }
  func.func @transform_6(%arg0: i32) -> (i32, i32) {
    %c0_i32 = arith.constant 0 : i32
    %c0_i32_0 = arith.constant 0 : i32
    %c0_i32_1 = arith.constant 0 : i32
    return %c0_i32, %c0_i32_0 : i32, i32
  }
  func.func @transform_7(%arg0: i32) -> (i32, i32) {
    %c0_i32 = arith.constant 0 : i32
    %c0_i32_0 = arith.constant 0 : i32
    %c0_i32_1 = arith.constant 0 : i32
    return %c0_i32, %c0_i32_0 : i32, i32
  }
  func.func @transform_8(%arg0: i32) -> (i32, i32) {
    %c0_i32 = arith.constant 0 : i32
    %c0_i32_0 = arith.constant 0 : i32
    %c0_i32_1 = arith.constant 0 : i32
    return %c0_i32, %c0_i32_0 : i32, i32
  }
  func.func @transform_9(%arg0: i32) -> (i32, i32) {
    %c0_i32 = arith.constant 0 : i32
    %c0_i32_0 = arith.constant 0 : i32
    return %c0_i32, %arg0 : i32, i32
  }
}

</mosaic_0001>

<bundles_post_ra>
// kernel: bqn_forward.1
= control target key start
LH: loop header
LB: loop body
LE: loop exit
PB: predicated region body
PF: predicated region fallthrough
CT: control target
= control target key end

     0   :  { %vm60_vm0 = vcmask 1043456   ;;  %v588_v2 = vmov 0.0   ;;  %vm47_vm1 = vcmask 31744   ;;  %v589_v5 = vmov 0   ;;  %s758_s0 = inlined_call_operand.vmem [shape: f32[8,256], index: 0, kind: input, shape index: {}]   ;;  %s759_s1 = inlined_call_operand.vmem [shape: f32[4,256], index: 1, kind: input, shape index: {}]   ;;  %s760_s2 = inlined_call_operand.vmem [shape: f32[32,8], index: 2, kind: input, shape index: {}]   ;;  %s761_s3 = inlined_call_operand.vmem [shape: f32[32,4], index: 3, kind: input, shape index: {}]   ;;  %s762_s4 = inlined_call_operand.vmem [shape: f32[32,1], index: 4, kind: input, shape index: {}]   ;;  %s763_s5 = inlined_call_operand.vmem [shape: f32[32,32], index: 5, kind: input, shape index: {}]   ;;  %s764_s6 = inlined_call_operand.vmem [shape: f32[32,1], index: 6, kind: input, shape index: {}]   ;;  %s765_s7 = inlined_call_operand.vmem [shape: f32[32,1], index: 7, kind: input, shape index: {}]   ;;  %s766_s8 = inlined_call_operand.<no memory space> [shape: f32[1,1], index: 8, kind: input, shape index: {}]   ;;  %s767_s9 = inlined_call_operand.hbm [shape: f32[1,256], index: 9, kind: output, shape index: {}]  }
   0x1   :  { %v44_v0 = vld [vmem:[%s759_s1] sm:$0xff]  ;;  %129 = vmatprep.mubr.f32.mxu0 %v588_v2  ;;  %141 = vmatprep.mubr.f32.mxu1 %v588_v2  ;;  %v39_v4 = vld [vmem:[%s758_s0 + $0x8] sm:$0xff]  ;;  %v42_v7 = vld [vmem:[%s761_s3 + $0x10] sm:$0xff] }
   0x2   :  { %v46_v1 = vcombine.high %v44_v0, %v44_v0  ;;  %v40_v3 = vld [vmem:[%s761_s3] sm:$0xff]  ;;  %561 = vset.pattern.permute.xlu0 %v589_v5  ;;  %562 = vset.pattern.permute.xlu1 %v589_v5  ;;  %v258_v9 = vld [vmem:[%s762_s4 + $0x10] sm:$0xff]  ;;  %v41_v10 = vld [vmem:[%s761_s3 + $0x8] sm:$0xff] }
   0x3   :  { %v38_v6 = vld [vmem:[%s758_s0] sm:$0xff] }
   0x4   :  { %525 = vmatprep.subr.msk.mxu0 %vm60_vm0, %v46_v1  ;;  %547 = vmatprep.subr.msk.mxu1 %vm60_vm0, %v46_v1  ;;  %v256_v8 = vld [vmem:[%s762_s4] sm:$0xff] }
   0x5   :  { %526 = vmatpush1.msk.msra.mxu0 %vm60_vm0, %v44_v0  ;;  %548 = vmatpush1.msk.msra.mxu1 %vm60_vm0, %v44_v0 }
   0x6   :  { %527 = vmatmul.mubr.msk.f32.vlgmr.msra.gmra.mrb[0].mxu0 %vm47_vm1, %v40_v3  ;;  %167 = vmatprep.subr.mxu0 %v39_v4 }
   0x7   :  { %168 = vmatpush1.msra.mxu0 %v38_v6  ;;  %135 = vmatprep.mubr.f32.mxu0 %v588_v2 }
   0x8   :  { %529 = vmatmul.mubr.msk.f32.vlgmr.msra.gmra.mrb[0].mxu1 %vm47_vm1, %v42_v7  ;;  %262 = vperm.xlu0 %561, %v256_v8  }
   0x9   :  { %15 = vsyncpa [#allocation4], 0  ;;  %147 = vmatprep.mubr.f32.mxu1 %v588_v2  ;;  %v43_v11 = vld [vmem:[%s761_s3 + $0x18] sm:$0xff]  ;;  %272 = vperm.xlu1 %562, %v258_v9   ;;  %v257_v12 = vld [vmem:[%s762_s4 + $0x8] sm:$0xff]  ;;  %vm154_vm2 = vcmask 64512   ;;  %vm324_vm3 = vcmask 261120  }
   0xa   :  { %528 = vmatmul.mubr.msk.f32.gmra.mrb[2].mxu0 %vm47_vm1, %v41_v10  ;;  %v259_v13 = vld [vmem:[%s762_s4 + $0x18] sm:$0xff]  ;;  %v34_v14 = vld [vmem:[%s760_s2] sm:$0xff]  ;;  %v301_v16 = vld [vmem:[%s764_s6 + $0x8] sm:$0xff]  ;;  %s591_s11 = smov [#allocation3]  }
   0xb   :  { %231 = vmatprep.mubr.f32.mxu0 %v588_v2  ;;  %v300_v15 = vld [vmem:[%s764_s6] sm:$0xff]  ;;  %v35_v17 = vld [vmem:[%s760_s2 + $0x8] sm:$0xff]  ;;  %v302_v18 = vld [vmem:[%s764_s6 + $0x10] sm:$0xff]  ;;  %s517_s12 = sshll.u32 %s591_s11, 4  ;;  %s518_s12 = int_to_ptr.vmem [resolvable:$true] %s517_s12 }
   0xc   :  { %530 = vmatmul.mubr.msk.f32.gmra.mrb[2].mxu1 %vm47_vm1, %v43_v11  ;;  %267 = vperm.xlu0 %561, %v257_v12   ;;  %v303_v19 = vld [vmem:[%s764_s6 + $0x18] sm:$0xff]  ;;  %v36_v20 = vld [vmem:[%s760_s2 + $0x10] sm:$0xff]  ;;  %v434_v21 = vld [vmem:[%s765_s7] sm:$0xff]  ;;  %s564_s13 = scalar_lea.vmem %s518_s12, 32  ;;  %p569_p1 = scmp.lt.s32.totalorder %s518_s12, %s518_s12 }
   0xd   :  { %277 = vperm.xlu1 %562, %v259_v13   ;;  %401 = vmatprep.mubr.f32.mxu1 %v588_v2  ;;  %v435_v22 = vld [vmem:[%s765_s7 + $0x8] sm:$0xff]  ;;  %v37_v23 = vld [vmem:[%s760_s2 + $0x18] sm:$0xff]  ;;  %v436_v24 = vld [vmem:[%s765_s7 + $0x10] sm:$0xff]  ;;  %p565_p0 = scmp.ne.s32.totalorder %s518_s12, %s564_s13  ;;  %p570_p2 = scmp.lt.s32.totalorder %s564_s13, %s564_s13 }
   0xe   :  { %531 = vmatmul.mubr.msk.f32.vlgmr.msra.gmra.mrb[0].mxu0 %vm154_vm2, %v34_v14  ;;  %v437_v25 = vld [vmem:[%s765_s7 + $0x18] sm:$0xff]  ;;  %v296_v3 = vld [vmem:[%s763_s5] sm:$0xff]  ;;  %v297_v4 = vld [vmem:[%s763_s5 + $0x8] sm:$0xff] }
   0xf   :  { %237 = vmatprep.mubr.f32.mxu0 %v588_v2  ;;  %v298_v5 = vld [vmem:[%s763_s5 + $0x10] sm:$0xff]  ;;  %v299_v6 = vld [vmem:[%s763_s5 + $0x18] sm:$0xff]  ;;  %p571_p3 = por %p570_p2, %p569_p1 }
  0x10   :  { %306 = vperm.xlu0 %561, %v300_v15  }
  0x11   :  { %311 = vperm.xlu1 %562, %v301_v16   ;;  %p572_p4 = pnand %p571_p3, %p565_p0 }
  0x12   :  { %532 = vmatmul.mubr.msk.f32.gmra.mrb[2].mxu0 %vm154_vm2, %v35_v17 }
  0x13   :  { %243 = vmatprep.mubr.f32.mxu0 %v588_v2 }
  0x14   :  { %316 = vperm.xlu0 %561, %v302_v18  }
  0x15   :  { %321 = vperm.xlu1 %562, %v303_v19  }
  0x16   :  { %533 = vmatmul.mubr.msk.f32.gmra.mrb[4].mxu0 %vm154_vm2, %v36_v20 }
  0x17   :  { %249 = vmatprep.mubr.f32.mxu0 %v588_v2 }
  0x18   :  { %440 = vperm.xlu0 %561, %v434_v21  }
  0x19   :  { %445 = vperm.xlu1 %562, %v435_v22  }
  0x1a   :  { %534 = vmatmul.mubr.msk.f32.gmra.mrb[6].mxu0 %vm154_vm2, %v37_v23 }
  0x1c   :  { %450 = vperm.xlu0 %561, %v436_v24  }
  0x1d   :  { %455 = vperm.xlu1 %562, %v437_v25  }
  0x87   :  { %v263_v28 = vpop.permute.xlu0 %262 }
  0x88   :  { %v273_v42 = vpop.permute.xlu1 %272 }
  0x8b   :  { %v268_v34 = vpop.permute.xlu0 %267 }
  0x8c   :  { %v278_v55 = vpop.permute.xlu1 %277 }
  0x8f   :  { %v307_v7 = vpop.permute.xlu0 %306 }
  0x90   :  { %v312_v8 = vpop.permute.xlu1 %311 }
  0x93   :  { %v317_v9 = vpop.permute.xlu0 %316 }
  0x94   :  { %v322_v13 = vpop.permute.xlu1 %321 }
  0x97   :  { %v441_v19 = vpop.permute.xlu0 %440 }
  0x98   :  { %v446_v22 = vpop.permute.xlu1 %445 }
  0xdb   :  { %v143_v26 = vpop.f32.mrb[0].mxu1 }
  0xdc   :  { %v145_v27 = vpop.f32.mrb[1].mxu1 }
  0xdf   :  { %v149_v29 = vpop.f32.mrb[2].mxu1 }
  0xe0   :  { %v151_v30 = vpop.f32.mrb[3].mxu1 }
  0xe1   :  { %v233_v31 = vpop.f32.mrb[0].mxu0 }
  0xe2   :  { %v235_v32 = vpop.f32.mrb[1].mxu0  ;;  %v280_v33 = vadd.f32 %v263_v28, %v233_v31 }
  0xe3   :  { %v281_v35 = vadd.f32 %v263_v28, %v235_v32 }
  0xe4   :  { %v288_v40 = vmax.f32 %v280_v33, 0.0 }
  0xe5   :  { %v239_v36 = vpop.f32.mrb[2].mxu0  ;;  %v289_v43 = vmax.f32 %v281_v35, 0.0 }
  0xe6   :  { %v282_v37 = vadd.f32 %v268_v34, %v239_v36  ;;  %v241_v38 = vpop.f32.mrb[3].mxu0 }
  0xe7   :  { %v283_v39 = vadd.f32 %v268_v34, %v241_v38  ;;  %v451_v34 = vpop.permute.xlu0 %450 }
  0xe8   :  { %v290_v41 = vmax.f32 %v282_v37, 0.0 }
  0xe9   :  { %v291_v44 = vmax.f32 %v283_v39, 0.0  ;;  %v245_v45 = vpop.f32.mrb[4].mxu0 }
  0xea   :  { %v541_v46 = vpack.c.bf16 %v290_v41, %v288_v40  ;;  %v246_v47 = vadd.f32 %v245_v45, %v143_v26  ;;  %v247_v48 = vpop.f32.mrb[5].mxu0  ;;  %v456_v45 = vpop.permute.xlu1 %455 }
  0xeb   :  { %v539_v49 = vpack.c.bf16 %v291_v44, %v289_v43  ;;  %v248_v50 = vadd.f32 %v247_v48, %v145_v27 }
  0xec   :  { %v284_v52 = vadd.f32 %v273_v42, %v246_v47 }
  0xed   :  { %v251_v51 = vpop.f32.mrb[6].mxu0  ;;  %540 = vmatprep.subr.bf16.mxu1 %v539_v49  ;;  %v285_v56 = vadd.f32 %v273_v42, %v248_v50 }
  0xee   :  { %v252_v53 = vadd.f32 %v251_v51, %v149_v29  ;;  %v253_v54 = vpop.f32.mrb[7].mxu0  ;;  %542 = vmatpush1.bf16.msra.mxu1 %v541_v46  ;;  %v292_v60 = vmax.f32 %v284_v52, 0.0 }
  0xef   :  { %v254_v57 = vadd.f32 %v253_v54, %v151_v30  ;;  %v293_v62 = vmax.f32 %v285_v56, 0.0 }
  0xf0   :  { %v286_v58 = vadd.f32 %v278_v55, %v252_v53 }
  0xf1   :  { %v287_v59 = vadd.f32 %v278_v55, %v254_v57 }
  0xf2   :  { %v294_v61 = vmax.f32 %v286_v58, 0.0  ;;  %v590_v58 = vmov 1966171168  }
  0xf3   :  { %v295_v63 = vmax.f32 %v287_v59, 0.0  ;;  %v492_v59 = vunpack.c.l.s4 %v590_v58 }
  0xf4   :  { %v545_v0 = vpack.c.bf16 %v294_v61, %v292_v60  ;;  %v494_v60 = vlaneseq }
  0xf5   :  { %v543_v1 = vpack.c.bf16 %v295_v63, %v293_v62 }
  0xf6   :  { %vm508_vm4 = vcmp.lt.s32.totalorder %v494_v60, 256 }
  0xf7   :  { %544 = vmatprep.subr.bf16.mxu1 %v543_v1  ;;  %v485_v1 = vstv %s766_s8 }
  0xf8   :  { %546 = vmatpush1.bf16.msra.mxu1 %v545_v0 }
  0xfb   :  { %535 = vmatmul.mubr.msk.f32.vlgmr.msra.gmra.mrb[4].mxu1 %vm324_vm3, %v296_v3  ;;  %v493_v3 = vunpack.c.0.s8 %v492_v59 }
  0xfc   :  { %407 = vmatprep.mubr.f32.mxu1 %v588_v2 }
  0xff   :  { %536 = vmatmul.mubr.msk.f32.gmra.mrb[6].mxu1 %vm324_vm3, %v297_v4  ;;  %v495_v4 = vshrl.u32 %v494_v60, 7 }
 0x100   :  { %413 = vmatprep.mubr.f32.mxu1 %v588_v2 }
 0x103   :  { %537 = vmatmul.mubr.msk.f32.gmra.mrb[8].mxu1 %vm324_vm3, %v298_v5 }
 0x104   :  { %419 = vmatprep.mubr.f32.mxu1 %v588_v2 }
 0x107   :  { %538 = vmatmul.mubr.msk.f32.gmra.mrb[10].mxu1 %vm324_vm3, %v299_v6 }
 0x1ce   :  { %v403_v10 = vpop.f32.mrb[4].mxu1 }
 0x1cf   :  { %v404_v11 = vadd.f32 %v403_v10, %v307_v7  ;;  %v405_v12 = vpop.f32.mrb[5].mxu1 }
 0x1d0   :  { %v406_v14 = vadd.f32 %v405_v12, %v307_v7 }
 0x1d1   :  { %v426_v16 = vmax.f32 %v404_v11, 0.0 }
 0x1d2   :  { %v409_v15 = vpop.f32.mrb[6].mxu1  ;;  %v427_v20 = vmax.f32 %v406_v14, 0.0 }
 0x1d3   :  { %v410_v17 = vadd.f32 %v409_v15, %v312_v8  ;;  %v411_v18 = vpop.f32.mrb[7].mxu1  ;;  %v458_v25 = vmul.f32 %v441_v19, %v426_v16 }
 0x1d4   :  { %v412_v2 = vadd.f32 %v411_v18, %v312_v8  ;;  %v459_v29 = vmul.f32 %v441_v19, %v427_v20 }
 0x1d5   :  { %v428_v21 = vmax.f32 %v410_v17, 0.0 }
 0x1d6   :  { %v429_v23 = vmax.f32 %v412_v2, 0.0  ;;  %v415_v24 = vpop.f32.mrb[8].mxu1 }
 0x1d7   :  { %v460_v26 = vmul.f32 %v446_v22, %v428_v21  ;;  %v416_v27 = vadd.f32 %v415_v24, %v317_v9  ;;  %v417_v28 = vpop.f32.mrb[9].mxu1 }
 0x1d8   :  { %v461_v30 = vmul.f32 %v446_v22, %v429_v23  ;;  %v418_v31 = vadd.f32 %v417_v28, %v317_v9  ;;  %v496_v9 = vsub.s32 %v493_v3, %v495_v4 }
 0x1d9   :  { %v466_v32 = vadd.f32 %v460_v26, %v458_v25  ;;  %v430_v33 = vmax.f32 %v416_v27, 0.0 }
 0x1da   :  { %v475_v35 = vadd.f32 %v461_v30, %v459_v29  ;;  %v431_v36 = vmax.f32 %v418_v31, 0.0  ;;  %v421_v37 = vpop.f32.mrb[10].mxu1 }
 0x1db   :  { %v462_v38 = vmul.f32 %v451_v34, %v430_v33  ;;  %v422_v39 = vadd.f32 %v421_v37, %v322_v13  ;;  %v423_v40 = vpop.f32.mrb[11].mxu1 }
 0x1dc   :  { %v463_v41 = vmul.f32 %v451_v34, %v431_v36  ;;  %v424_v42 = vadd.f32 %v423_v40, %v322_v13 }
 0x1dd   :  { %v467_v43 = vadd.f32 %v466_v32, %v462_v38  ;;  %v432_v44 = vmax.f32 %v422_v39, 0.0 }
 0x1de   :  { %v476_v46 = vadd.f32 %v475_v35, %v463_v41  ;;  %v433_v47 = vmax.f32 %v424_v42, 0.0 }
 0x1df   :  { %v464_v48 = vmul.f32 %v456_v45, %v432_v44 }
 0x1e0   :  { %v465_v49 = vmul.f32 %v456_v45, %v433_v47 }
 0x1e1   :  { %v468_v50 = vadd.f32 %v467_v43, %v464_v48 }
 0x1e2   :  { %v477_v51 = vadd.f32 %v476_v46, %v465_v49 }
 0x1e3   :  { %v469_v52 = vrot.slane %v468_v50, 4 }
 0x1e4   :  { %v478_v53 = vrot.slane %v477_v51, 4 }
 0x1e5   :  { %v470_v54 = vadd.f32 %v469_v52, %v468_v50 }
 0x1e6   :  { %v479_v55 = vadd.f32 %v478_v53, %v477_v51 }
 0x1e7   :  { %v471_v56 = vrot.slane %v470_v54, 2 }
 0x1e8   :  { %v480_v57 = vrot.slane %v479_v55, 2 }
 0x1e9   :  { %v472_v61 = vadd.f32 %v471_v56, %v470_v54 }
 0x1ea   :  { %v481_v62 = vadd.f32 %v480_v57, %v479_v55 }
 0x1eb   :  { %v473_v63 = vrot.slane %v472_v61, 1 }
 0x1ec   :  { %v482_v0 = vrot.slane %v481_v62, 1 }
 0x1ed   :  { %v474_v5 = vadd.f32 %v473_v63, %v472_v61 }
 0x1ee   :  { %v483_v6 = vadd.f32 %v482_v0, %v481_v62 }
 0x1ef   :  { %v486_v7 = vadd.f32 %v485_v1, %v474_v5 }
 0x1f0   :  { %v487_v8 = vadd.f32 %v485_v1, %v483_v6 }
 0x1f2   :  { %v490_v10 = vcombine.low %v486_v7, %v487_v8 }
 0x1f4   :  { %v497_v11 = vrot.slane %v490_v10, %v496_v9 }
 0x1f6   :  { %v504_v12 = vrot.slane %v497_v11, %v496_v9 }
 0x1f8   :  { %510 = vst.msk [vmem:[#allocation3] sm:$0x3] %vm508_vm4, %v504_v12 }
 0x1f9   :  { %575 = shalt.err (!%p572_p4)
}
 0x1fa   :  { %s576_s1 = scalar_lea.hbm %s767_s9, 32 }
 0x1fb   :  { %p577_p5 = scmp.ne.s32.totalorder %s767_s9, %s576_s1  ;;  %p580_p6 = scmp.lt.u32.totalorder %s576_s1, %s767_s9 }
 0x1fd   :  { %p582_p7 = pnand %p580_p6, %p577_p5 }
 0x1ff   :  { %585 = shalt.err (!%p582_p7)
}
 0x200   :  { %520 = dma.vmem_to_hbm [thread:$0]  %s518_s12, 32, %s767_s9, [#allocation4]  }
 0x201   :  { %586 = dma.done.wait [#allocation4], 32  }
 0x202   :  { %587 = vsyncadd [#allocation4], 4294967264 }
 0x203   :  { %524 = vsyncpa [#allocation4], 1 }

</bundles_post_ra>
